<compile_context>
chip_gen: v7x
topology: tpu7x:2x2x1
jax: 0.10.0
libtpu: 0.0.40
codegen_flags: <defaults>
</compile_context>

<pallas_src>
import jax
import jax.numpy as jnp
from jax.experimental import pallas as pl
from jax.experimental.pallas import tpu as pltpu


def se_basic_block_kernel(x_ref, w1_ref, w2_ref, bn_ref, se_ref, o_ref):
    x = x_ref[...]                                      # (NB, C, L) f32
    NB, C, L = x.shape
    Cr = (se_ref.shape[0] - 2) // 2

    # --- packed per-channel params (VMEM-resident across grid steps) ---
    bn = bn_ref[...]                                    # (C, 3) f32
    bn1s = bn[:, 0:1][None]                             # (1, C, 1)
    bn1b = bn[:, 1:2][None]
    bn2b = bn[:, 2:3][None]                             # bn2 scale is folded into w2
    se = se_ref[...]                                    # (2*Cr + 2, C) f32
    fc1w = se[0:Cr, :]                                  # (Cr, C)   == fc1_w
    fc2wT = se[Cr:2 * Cr, :]                            # (Cr, C)   == fc2_w.T
    fc1b = se[2 * Cr:2 * Cr + 1, 0:Cr]                  # (1, Cr)
    fc2b = se[2 * Cr + 1:2 * Cr + 2, :]                 # (1, C)

    # Broadcast the tiny conv weights over the block batch once (hoisted; the batched
    # dot_general below keeps the output in (NB, C, L) order with no transposes).
    w1 = jnp.broadcast_to(w1_ref[...][None], (NB,) + w1_ref.shape)   # (NB, C, 3C) bf16
    w2 = jnp.broadcast_to(w2_ref[...][None], (NB,) + w2_ref.shape)

    # Conv1d(padding=1) boundary masks, computed once and shared by both convs.
    lane = jax.lax.broadcasted_iota(jnp.int32, (1, 1, L), 2)
    not_first = lane != 0
    not_last = lane != L - 1

    def conv3(inp, w_b):
        # inp: (NB, C, L) f32.  w_b: (NB, C, 3C) bf16, tap-major cols [k=0 | k=1 | k=2].
        # Shift along lanes via the XLU, zero the wrapped lane (padding=1), stack the
        # taps on the sublane axis (f32, tile-aligned), cast once, one MXU matmul K=3C.
        prev = jnp.where(not_first, pltpu.roll(inp, shift=1, axis=2), 0.0)      # x[l-1]
        nxt = jnp.where(not_last, pltpu.roll(inp, shift=L - 1, axis=2), 0.0)    # x[l+1]
        stk = jnp.concatenate([prev, inp, nxt], axis=1).astype(jnp.bfloat16)    # (NB,3C,L)
        return jnp.einsum("nok,nkl->nol", w_b, stk,
                          preferred_element_type=jnp.float32)                   # (NB,C,L)

    # conv1 -> relu -> bn1   (relu BEFORE bn1, exactly as in the PyTorch forward)
    out = conv3(x, w1)
    out = jnp.maximum(out, 0.0) * bn1s + bn1b
    # conv2 -> bn2 (scale pre-folded into w2, only the bias add remains)
    out = conv3(out, w2) + bn2b

    # SE gate, batched over all NB samples in the block (two small 2-D matmuls).
    y = jnp.mean(out, axis=2)                            # (NB, C)
    h = jax.lax.dot_general(y, fc1w, (((1,), (1,)), ((), ())),
                            preferred_element_type=jnp.float32) + fc1b          # (NB, Cr)
    h = jnp.maximum(h, 0.0)
    s = jax.nn.sigmoid(jnp.dot(h, fc2wT, preferred_element_type=jnp.float32) + fc2b)

    # channel-wise gate, residual add, final relu
    o_ref[...] = jnp.maximum(out * s[:, :, None] + x, 0.0).astype(o_ref.dtype)


def _pick_block_batch(n, target=64):
    """Largest NB <= target dividing N; keep >= 2 grid steps when N allows (v7x TCs)."""
    upper = min(target, n)
    if n >= 2:
        upper = min(upper, pl.cdiv(n, 2))
    nb = max(1, upper)
    while n % nb:
        nb -= 1
    return nb


def se_basic_block_1d(x_ncl, params, eps=1e-5, block_batch=64):
    """x_ncl: (N, C, L) float32, PyTorch NCL convention (kept as-is inside the kernel)."""
    N, C, L = x_ncl.shape
    x = x_ncl.astype(jnp.float32)
    NB = _pick_block_batch(N, block_batch)

    # Fold BatchNorm (inference) into per-channel scale/bias.
    def fold_bn(gamma, beta, mean, var):
        scale = gamma / jnp.sqrt(var + eps)
        return scale, beta - mean * scale

    bn1s, bn1b = fold_bn(*params["bn1"])
    bn2s, bn2b = fold_bn(*params["bn2"])

    # Conv weights (Cout, Cin, 3) -> tap-stacked (Cout, 3*Cin) bf16; bn2 scale folded
    # into conv2's output channels (exact: conv2 feeds bn2 directly).
    def stack_w(w, out_scale=None):
        w = w.astype(jnp.float32)
        if out_scale is not None:
            w = w * out_scale[:, None, None]
        return jnp.concatenate([w[:, :, 0], w[:, :, 1], w[:, :, 2]],
                               axis=1).astype(jnp.bfloat16)

    w1_stk = stack_w(params["conv1_w"])
    w2_stk = stack_w(params["conv2_w"], out_scale=bn2s)

    # Packed per-channel params: (C, 3) columns and a row-oriented SE pack.
    bn_pack = jnp.stack([bn1s, bn1b, bn2b], axis=1).astype(jnp.float32)       # (C, 3)
    fc1_w = params["fc1_w"].astype(jnp.float32)                               # (Cr, C)
    fc2_w = params["fc2_w"].astype(jnp.float32)                               # (C, Cr)
    Cr = fc1_w.shape[0]
    fc1b_row = jnp.zeros((C,), jnp.float32).at[:Cr].set(params["fc1_b"].astype(jnp.float32))
    se_pack = jnp.concatenate([fc1_w, fc2_w.T, fc1b_row[None, :],
                               params["fc2_b"].astype(jnp.float32)[None, :]],
                              axis=0)                                         # (2Cr+2, C)

    def const2d(shape):
        return pl.BlockSpec(shape, lambda n: (0, 0))

    block_spec = pl.BlockSpec((NB, C, L), lambda n: (n, 0, 0))

    flops = N * (2 * (2 * C * (3 * C) * L) + 2 * (2 * C * Cr))
    bytes_accessed = (2 * N * C * L * 4                       # x in + out
                      + 2 * C * 3 * C * 2                     # bf16 conv weights
                      + (3 * C + (2 * Cr + 2) * C) * 4)       # packed bn / SE params

    out = pl.pallas_call(
        se_basic_block_kernel,
        out_shape=jax.ShapeDtypeStruct((N, C, L), jnp.float32),
        grid=(N // NB,),
        in_specs=[
            block_spec,                                       # x, (NB, C, L) per step
            const2d((C, 3 * C)), const2d((C, 3 * C)),         # stacked conv1/conv2 w
            const2d((C, 3)),                                  # packed bn params
            const2d((2 * Cr + 2, C)),                         # packed SE params
        ],
        out_specs=block_spec,
        compiler_params=pltpu.CompilerParams(
            dimension_semantics=("parallel",),                # v7x: 2 TCs split the grid
            # Working set per step is ~10*NB*C*L*4 bytes (<4 MiB at NB=64, L=128); 32 MiB
            # is comfortably inside v7x's 64 MiB physical VMEM and fine on v5e/v6e.
            vmem_limit_bytes=32 * 1024 * 1024,
        ),
        cost_estimate=pl.CostEstimate(
            flops=flops, transcendentals=N * C, bytes_accessed=bytes_accessed),
    )(x, w1_stk, w2_stk, bn_pack, se_pack)
    return out


def _reference(x, params, eps=1e-5):
    """Plain-JAX f32 (HIGHEST precision) reference of the PyTorch forward, NCL layout."""
    N, C, L = x.shape
    hi = jax.lax.Precision.HIGHEST

    def conv3(inp, w):                                   # w: (Cout, Cin, 3)
        xp = jnp.pad(inp, ((0, 0), (0, 0), (1, 1)))
        out = jnp.zeros((N, C, L), jnp.float32)
        for k in range(3):
            out = out + jnp.einsum("oi,nil->nol", w[:, :, k], xp[:, :, k:k + L],
                                   precision=hi)
        return out

    def bn(o, gamma, beta, mean, var):
        s = gamma / jnp.sqrt(var + eps)
        b = beta - mean * s
        return o * s[None, :, None] + b[None, :, None]

    out = conv3(x, params["conv1_w"])
    out = jnp.maximum(out, 0.0)
    out = bn(out, *params["bn1"])
    out = conv3(out, params["conv2_w"])
    out = bn(out, *params["bn2"])
    y = jnp.mean(out, axis=2)                            # (N, C)
    h = jnp.maximum(y @ params["fc1_w"].T + params["fc1_b"], 0.0)
    s = jax.nn.sigmoid(h @ params["fc2_w"].T + params["fc2_b"])
    out = out * s[:, :, None]
    return jnp.maximum(out + x, 0.0)


if __name__ == "__main__":
    # Small shapes consistent with the module: inplanes = planes = 8 (residual requires
    # matching channels when downsample is None), reduction=4 -> SE hidden = 2.
    # N=8 with NB=4 -> 2 grid steps; L=128 keeps the lane axis dense.
    N, C, L, reduction = 8, 8, 128, 4
    Cr = C // reduction

    key = jax.random.PRNGKey(0)
    ks = jax.random.split(key, 13)

    params = {
        "conv1_w": jax.random.normal(ks[0], (C, C, 3), jnp.float32) * 0.2,
        "conv2_w": jax.random.normal(ks[1], (C, C, 3), jnp.float32) * 0.2,
        "bn1": (jax.random.uniform(ks[2], (C,), jnp.float32, 0.5, 1.5),   # gamma
                jax.random.normal(ks[3], (C,), jnp.float32) * 0.1,        # beta
                jax.random.normal(ks[4], (C,), jnp.float32) * 0.1,        # running_mean
                jax.random.uniform(ks[5], (C,), jnp.float32, 0.5, 1.5)),  # running_var
        "bn2": (jax.random.uniform(ks[6], (C,), jnp.float32, 0.5, 1.5),
                jax.random.normal(ks[7], (C,), jnp.float32) * 0.1,
                jax.random.normal(ks[8], (C,), jnp.float32) * 0.1,
                jax.random.uniform(ks[9], (C,), jnp.float32, 0.5, 1.5)),
        "fc1_w": jax.random.normal(ks[10], (Cr, C), jnp.float32) * 0.3,
        "fc1_b": jnp.zeros((Cr,), jnp.float32),
        "fc2_w": jax.random.normal(ks[11], (C, Cr), jnp.float32) * 0.3,
        "fc2_b": jnp.zeros((C,), jnp.float32),
    }

    x = jax.random.normal(ks[12], (N, C, L), jnp.float32)

    out = jax.block_until_ready(se_basic_block_1d(x, params))
    ref = jax.block_until_ready(_reference(x, params))

    assert out.shape == (N, C, L), out.shape
    err = jnp.abs(out - ref)
    max_err = float(jnp.max(err))
    mean_err = float(jnp.mean(err))
    # Tolerances account for bf16 MXU operands in the two conv matmuls; a layout /
    # tap-direction / masking bug would produce O(1) errors and fail these checks.
    assert max_err < 1e-1, f"max err vs reference: {max_err}"
    assert mean_err < 1e-2, f"mean err vs reference: {mean_err}"
    print("KERNEL_OK")
</pallas_src>

<mosaic_0001>
module attributes {stable_mosaic.version = 11 : i64} {
  func.func @se_basic_block_kernel(%arg0: i32, %arg1: memref<4x8x128xf32, #tpu.memory_space<vmem>>, %arg2: memref<8x24xbf16, #tpu.memory_space<vmem>>, %arg3: memref<8x24xbf16, #tpu.memory_space<vmem>>, %arg4: memref<8x3xf32, #tpu.memory_space<vmem>>, %arg5: memref<6x8xf32, #tpu.memory_space<vmem>>, %arg6: memref<4x8x128xf32, #tpu.memory_space<vmem>>) attributes {dimension_semantics = [#tpu.dimension_semantics<parallel>], iteration_bounds = array<i64: 2>, scalar_prefetch = 0 : i64, scratch_operands = 0 : i64, tpu.core_type = #tpu.core_type<tc>, window_params = [{transform_indices = @transform_0, window_bounds = array<i64: 4, 8, 128>}, {pipeline_mode = #tpu.pipeline_mode<synchronous>, transform_indices = @transform_1, window_bounds = array<i64: 8, 24>}, {pipeline_mode = #tpu.pipeline_mode<synchronous>, transform_indices = @transform_2, window_bounds = array<i64: 8, 24>}, {pipeline_mode = #tpu.pipeline_mode<synchronous>, transform_indices = @transform_3, window_bounds = array<i64: 8, 3>}, {pipeline_mode = #tpu.pipeline_mode<synchronous>, transform_indices = @transform_4, window_bounds = array<i64: 6, 8>}, {transform_indices = @transform_5, window_bounds = array<i64: 4, 8, 128>}]} {
    %c0 = arith.constant 0 : index
    %c0_0 = arith.constant 0 : index
    %c0_1 = arith.constant 0 : index
    %0 = vector.load %arg1[%c0, %c0_0, %c0_1] : memref<4x8x128xf32, #tpu.memory_space<vmem>>, vector<4x8x128xf32>
    %c0_2 = arith.constant 0 : index
    %c0_3 = arith.constant 0 : index
    %1 = vector.load %arg4[%c0_2, %c0_3] : memref<8x3xf32, #tpu.memory_space<vmem>>, vector<8x3xf32>
    %2 = vector.extract_strided_slice %1 {offsets = [0, 0], sizes = [8, 1], strides = [1, 1]} : vector<8x3xf32> to vector<8x1xf32>
    %3 = vector.shape_cast %2 : vector<8x1xf32> to vector<1x8x1xf32>
    %4 = vector.extract_strided_slice %1 {offsets = [0, 1], sizes = [8, 1], strides = [1, 1]} : vector<8x3xf32> to vector<8x1xf32>
    %5 = vector.shape_cast %4 : vector<8x1xf32> to vector<1x8x1xf32>
    %6 = vector.extract_strided_slice %1 {offsets = [0, 2], sizes = [8, 1], strides = [1, 1]} : vector<8x3xf32> to vector<8x1xf32>
    %7 = vector.shape_cast %6 : vector<8x1xf32> to vector<1x8x1xf32>
    %c0_4 = arith.constant 0 : index
    %c0_5 = arith.constant 0 : index
    %8 = vector.load %arg5[%c0_4, %c0_5] : memref<6x8xf32, #tpu.memory_space<vmem>>, vector<6x8xf32>
    %9 = vector.extract_strided_slice %8 {offsets = [0, 0], sizes = [2, 8], strides = [1, 1]} : vector<6x8xf32> to vector<2x8xf32>
    %10 = vector.extract_strided_slice %8 {offsets = [2, 0], sizes = [2, 8], strides = [1, 1]} : vector<6x8xf32> to vector<2x8xf32>
    %11 = vector.extract_strided_slice %8 {offsets = [4, 0], sizes = [1, 2], strides = [1, 1]} : vector<6x8xf32> to vector<1x2xf32>
    %12 = vector.extract_strided_slice %8 {offsets = [5, 0], sizes = [1, 8], strides = [1, 1]} : vector<6x8xf32> to vector<1x8xf32>
    %c0_6 = arith.constant 0 : index
    %c0_7 = arith.constant 0 : index
    %13 = vector.load %arg2[%c0_6, %c0_7] : memref<8x24xbf16, #tpu.memory_space<vmem>>, vector<8x24xbf16>
    %14 = vector.shape_cast %13 : vector<8x24xbf16> to vector<1x8x24xbf16>
    %15 = vector.shape_cast %14 : vector<1x8x24xbf16> to vector<1x8x24xbf16>
    %16 = vector.broadcast %15 : vector<1x8x24xbf16> to vector<4x8x24xbf16>
    %c0_8 = arith.constant 0 : index
    %c0_9 = arith.constant 0 : index
    %17 = vector.load %arg3[%c0_8, %c0_9] : memref<8x24xbf16, #tpu.memory_space<vmem>>, vector<8x24xbf16>
    %18 = vector.shape_cast %17 : vector<8x24xbf16> to vector<1x8x24xbf16>
    %19 = vector.shape_cast %18 : vector<1x8x24xbf16> to vector<1x8x24xbf16>
    %20 = vector.broadcast %19 : vector<1x8x24xbf16> to vector<4x8x24xbf16>
    %21 = tpu.iota {dimensions = array<i32: 2>} : vector<1x1x128xi32>
    %c0_i32 = arith.constant 0 : i32
    %22 = vector.broadcast %c0_i32 : i32 to vector<1x1x128xi32>
    %23 = arith.cmpi ne, %21, %22 : vector<1x1x128xi32>
    %c127_i32 = arith.constant 127 : i32
    %24 = vector.broadcast %c127_i32 : i32 to vector<1x1x128xi32>
    %25 = arith.cmpi ne, %21, %24 : vector<1x1x128xi32>
    %c1_i32 = arith.constant 1 : i32
    %26 = tpu.dynamic_rotate %0 by %c1_i32 dim 2 : vector<4x8x128xf32>, i32 -> vector<4x8x128xf32>
    %cst = arith.constant 0.000000e+00 : f32
    %27 = vector.shape_cast %23 : vector<1x1x128xi1> to vector<1x1x128xi1>
    %28 = vector.broadcast %27 : vector<1x1x128xi1> to vector<4x8x128xi1>
    %29 = vector.broadcast %cst : f32 to vector<4x8x128xf32>
    %30 = arith.select %28, %26, %29 : vector<4x8x128xi1>, vector<4x8x128xf32>
    %c127_i32_10 = arith.constant 127 : i32
    %31 = tpu.dynamic_rotate %0 by %c127_i32_10 dim 2 : vector<4x8x128xf32>, i32 -> vector<4x8x128xf32>
    %cst_11 = arith.constant 0.000000e+00 : f32
    %32 = vector.shape_cast %25 : vector<1x1x128xi1> to vector<1x1x128xi1>
    %33 = vector.broadcast %32 : vector<1x1x128xi1> to vector<4x8x128xi1>
    %34 = vector.broadcast %cst_11 : f32 to vector<4x8x128xf32>
    %35 = arith.select %33, %31, %34 : vector<4x8x128xi1>, vector<4x8x128xf32>
    %36 = tpu.concatenate %30, %0, %35 in 1 : vector<4x8x128xf32>, vector<4x8x128xf32>, vector<4x8x128xf32> -> vector<4x24x128xf32>
    %37 = arith.truncf %36 : vector<4x24x128xf32> to vector<4x24x128xbf16>
    "tpu.trace_start"() <{level = 10 : i32, message = "nok,nkl->nol"}> : () -> ()
    %cst_12 = arith.constant dense<0.000000e+00> : vector<4x8x128xf32>
    %38 = tpu.matmul %16, %37, %cst_12 {dimension_numbers = #tpu.dot_dimension_numbers<[2], [1], [1], [2], [0, 0, 0, 1, 1, 2], [0], [0]>} : vector<4x8x24xbf16>, vector<4x24x128xbf16>, vector<4x8x128xf32> -> vector<4x8x128xf32>
    "tpu.trace_stop"() : () -> ()
    %cst_13 = arith.constant 0.000000e+00 : f32
    %39 = vector.broadcast %cst_13 : f32 to vector<4x8x128xf32>
    %40 = arith.maximumf %38, %39 : vector<4x8x128xf32>
    %41 = vector.broadcast %3 : vector<1x8x1xf32> to vector<4x8x128xf32>
    %42 = arith.mulf %40, %41 : vector<4x8x128xf32>
    %43 = vector.broadcast %5 : vector<1x8x1xf32> to vector<4x8x128xf32>
    %44 = arith.addf %42, %43 : vector<4x8x128xf32>
    %c1_i32_14 = arith.constant 1 : i32
    %45 = tpu.dynamic_rotate %44 by %c1_i32_14 dim 2 : vector<4x8x128xf32>, i32 -> vector<4x8x128xf32>
    %cst_15 = arith.constant 0.000000e+00 : f32
    %46 = vector.shape_cast %23 : vector<1x1x128xi1> to vector<1x1x128xi1>
    %47 = vector.broadcast %46 : vector<1x1x128xi1> to vector<4x8x128xi1>
    %48 = vector.broadcast %cst_15 : f32 to vector<4x8x128xf32>
    %49 = arith.select %47, %45, %48 : vector<4x8x128xi1>, vector<4x8x128xf32>
    %c127_i32_16 = arith.constant 127 : i32
    %50 = tpu.dynamic_rotate %44 by %c127_i32_16 dim 2 : vector<4x8x128xf32>, i32 -> vector<4x8x128xf32>
    %cst_17 = arith.constant 0.000000e+00 : f32
    %51 = vector.shape_cast %25 : vector<1x1x128xi1> to vector<1x1x128xi1>
    %52 = vector.broadcast %51 : vector<1x1x128xi1> to vector<4x8x128xi1>
    %53 = vector.broadcast %cst_17 : f32 to vector<4x8x128xf32>
    %54 = arith.select %52, %50, %53 : vector<4x8x128xi1>, vector<4x8x128xf32>
    %55 = tpu.concatenate %49, %44, %54 in 1 : vector<4x8x128xf32>, vector<4x8x128xf32>, vector<4x8x128xf32> -> vector<4x24x128xf32>
    %56 = arith.truncf %55 : vector<4x24x128xf32> to vector<4x24x128xbf16>
    "tpu.trace_start"() <{level = 10 : i32, message = "nok,nkl->nol"}> : () -> ()
    %cst_18 = arith.constant dense<0.000000e+00> : vector<4x8x128xf32>
    %57 = tpu.matmul %20, %56, %cst_18 {dimension_numbers = #tpu.dot_dimension_numbers<[2], [1], [1], [2], [0, 0, 0, 1, 1, 2], [0], [0]>} : vector<4x8x24xbf16>, vector<4x24x128xbf16>, vector<4x8x128xf32> -> vector<4x8x128xf32>
    "tpu.trace_stop"() : () -> ()
    %58 = vector.broadcast %7 : vector<1x8x1xf32> to vector<4x8x128xf32>
    %59 = arith.addf %57, %58 : vector<4x8x128xf32>
    %cst_19 = arith.constant dense<0.000000e+00> : vector<4x8xf32>
    %60 = vector.multi_reduction <add>, %59, %cst_19 [2] : vector<4x8x128xf32> to vector<4x8xf32>
    %cst_20 = arith.constant 1.280000e+02 : f32
    %61 = vector.broadcast %cst_20 : f32 to vector<4x8xf32>
    %62 = arith.divf %60, %61 : vector<4x8xf32>
    %cst_21 = arith.constant dense<0.000000e+00> : vector<4x2xf32>
    %63 = tpu.matmul %62, %9, %cst_21 {dimension_numbers = #tpu.dot_dimension_numbers<[1], [1], [0], [0], [0, 0, 1, 0], [], []>} : vector<4x8xf32>, vector<2x8xf32>, vector<4x2xf32> -> vector<4x2xf32>
    %64 = vector.broadcast %11 : vector<1x2xf32> to vector<4x2xf32>
    %65 = arith.addf %63, %64 : vector<4x2xf32>
    %cst_22 = arith.constant 0.000000e+00 : f32
    %66 = vector.broadcast %cst_22 : f32 to vector<4x2xf32>
    %67 = arith.maximumf %65, %66 : vector<4x2xf32>
    %cst_23 = arith.constant dense<0.000000e+00> : vector<4x8xf32>
    %68 = tpu.matmul %67, %10, %cst_23 {dimension_numbers = #tpu.dot_dimension_numbers<[1], [0], [0], [1], [0, 0, 1, 1], [], []>} : vector<4x2xf32>, vector<2x8xf32>, vector<4x8xf32> -> vector<4x8xf32>
    %69 = vector.broadcast %12 : vector<1x8xf32> to vector<4x8xf32>
    %70 = arith.addf %68, %69 : vector<4x8xf32>
    %71 = arith.negf %70 : vector<4x8xf32>
    %72 = math.exp %71 : vector<4x8xf32>
    %cst_24 = arith.constant 1.000000e+00 : f32
    %73 = vector.broadcast %cst_24 : f32 to vector<4x8xf32>
    %74 = arith.addf %73, %72 : vector<4x8xf32>
    %75 = arith.divf %73, %74 : vector<4x8xf32>
    %76 = vector.shape_cast %75 : vector<4x8xf32> to vector<4x8x1xf32>
    %77 = vector.broadcast %76 : vector<4x8x1xf32> to vector<4x8x128xf32>
    %78 = arith.mulf %59, %77 : vector<4x8x128xf32>
    %79 = arith.addf %78, %0 : vector<4x8x128xf32>
    %cst_25 = arith.constant 0.000000e+00 : f32
    %80 = vector.broadcast %cst_25 : f32 to vector<4x8x128xf32>
    %81 = arith.maximumf %79, %80 : vector<4x8x128xf32>
    %c0_26 = arith.constant 0 : index
    %c0_27 = arith.constant 0 : index
    %c0_28 = arith.constant 0 : index
    %82 = vector.load %arg6[%c0_26, %c0_27, %c0_28] : memref<4x8x128xf32, #tpu.memory_space<vmem>>, vector<4x8x128xf32>
    tpu.vector_store %arg6[%c0_26, %c0_27, %c0_28], %81 {strides = array<i32>} : memref<4x8x128xf32, #tpu.memory_space<vmem>>, vector<4x8x128xf32>,
    return
  }
  func.func @transform_0(%arg0: i32) -> (i32, i32, i32) {
    %c0_i32 = arith.constant 0 : i32
    %c0_i32_0 = arith.constant 0 : i32
    %c0_i32_1 = arith.constant 0 : i32
    return %arg0, %c0_i32, %c0_i32_0 : i32, i32, i32
  }
  func.func @transform_1(%arg0: i32) -> (i32, i32) {
    %c0_i32 = arith.constant 0 : i32
    %c0_i32_0 = arith.constant 0 : i32
    %c0_i32_1 = arith.constant 0 : i32
    return %c0_i32, %c0_i32_0 : i32, i32
  }
  func.func @transform_2(%arg0: i32) -> (i32, i32) {
    %c0_i32 = arith.constant 0 : i32
    %c0_i32_0 = arith.constant 0 : i32
    %c0_i32_1 = arith.constant 0 : i32
    return %c0_i32, %c0_i32_0 : i32, i32
  }
  func.func @transform_3(%arg0: i32) -> (i32, i32) {
    %c0_i32 = arith.constant 0 : i32
    %c0_i32_0 = arith.constant 0 : i32
    %c0_i32_1 = arith.constant 0 : i32
    return %c0_i32, %c0_i32_0 : i32, i32
  }
  func.func @transform_4(%arg0: i32) -> (i32, i32) {
    %c0_i32 = arith.constant 0 : i32
    %c0_i32_0 = arith.constant 0 : i32
    %c0_i32_1 = arith.constant 0 : i32
    return %c0_i32, %c0_i32_0 : i32, i32
  }
  func.func @transform_5(%arg0: i32) -> (i32, i32, i32) {
    %c0_i32 = arith.constant 0 : i32
    %c0_i32_0 = arith.constant 0 : i32
    %c0_i32_1 = arith.constant 0 : i32
    return %arg0, %c0_i32, %c0_i32_0 : i32, i32, i32
  }
}

</mosaic_0001>

<bundles_post_ra>
// kernel: tpu_custom_call.1
= control target key start
LH: loop header
LB: loop body
LE: loop exit
PB: predicated region body
PF: predicated region fallthrough
CT: control target
= control target key end

     0   :  { %10 = vsyncpa [#allocation3], 0  ;;  %s1873_s0 = inlined_call_operand.hbm [shape: f32[8,8,128], index: 0, kind: input, shape index: {}]   ;;  %s1874_s1 = inlined_call_operand.vmem [shape: bf16[8,24], index: 1, kind: input, shape index: {}]   ;;  %s1875_s2 = inlined_call_operand.hbm [shape: bf16[8,24], index: 2, kind: input, shape index: {}]   ;;  %s1876_s3 = inlined_call_operand.vmem [shape: f32[8,3], index: 3, kind: input, shape index: {}]   ;;  %s1877_s4 = inlined_call_operand.vmem [shape: f32[6,8], index: 4, kind: input, shape index: {}]   ;;  %s1878_s5 = inlined_call_operand.hbm [shape: f32[8,8,128], index: 5, kind: output, shape index: {}]  }
   0x1   :  { %12 = vsyncpa [#allocation3 + $0x1], 0 }
   0x2   :  { %13 = vsyncpa [#allocation6], 0 }
   0x3   :  { %14 = vsyncpa [#allocation4], 0 }
   0x4   :  { %16 = vsyncpa [#allocation4 + $0x1], 0  ;;  %s1514_s18 = smov 0   ;;  %s1516_s19 = smov 0  }
   0x5   :  { %s1518_s20 = smov 0   ;;  %s1520_s21 = smov 0  }
   0x6 LB: > { %s1535_s22 = sadd.s32 4294967295, %s1467_s21   ;;  %s1065_s23 = sadd.s32 4294967294, %s1467_s21   ;;  %s1467_s21 = sphi %s1520_s21, %s1905_s21   ;;  %s1463_s20 = sphi %s1518_s20, %s1904_s20   ;;  %s1459_s19 = sphi %s1516_s19, %s1903_s19   ;;  %s1455_s18 = sphi %s1514_s18, %s1902_s18  }
   0x7   : > { %s1539_s24 = sadd.s32 1, %s1467_s21   ;;  %s29_s25 = sadd.s32 1, %s1463_s20 }
   0x8   : > { %s26_s26 = ssub.s32 %s1467_s21, %s1539_s24  ;;  %p36_p0 = scmp.ne.s32.totalorder %s1463_s20, %s1459_s19 }
   0x9   : > { %p27_p1 = scmp.eq.s32.totalorder %s26_s26, 0  ;;  %p37_p2 = scmp.eq.s32.totalorder %s1467_s21, 0 }
   0xa   : > { %p42_p3 = scmp.ne.s32.totalorder %s1459_s19, %s1455_s18  ;;  %p1879_p4 = scmp.eq.s32.totalorder %s1535_s22, 0 }
   0xb   : > { %s1551_s27 = scalar_select %p27_p1, %s1463_s20, %s29_s25  }
   0xc   : > { %p1553_p5 = por %p37_p2, %p36_p0  ;;  %p1559_p6 = por %p1879_p4, %p42_p3 }
   0xd   : > { %p150_p7 = scmp.eq.s32.totalorder %s1535_s22, 1  ;;  %p156_p8 = scmp.eq.s32.totalorder %s1065_s23, 1 }
   0xe   : > { %s1885_s29 = scalar_select %p1559_p6, 1, 0 }
   0xf   : > { %p1066_p9 = scmp.ge.s32.totalorder %s1467_s21, 1  ;;  %p163_p10 = scmp.lt.s32.totalorder %s1467_s21, 3 }
  0x10   : > { %p1566_p11 = por %p150_p7, %p36_p0  ;;  %p1570_p12 = por %p156_p8, %p42_p3 }
  0x11   : > { %p1574_p13 = pnand %p1066_p9, %p163_p10  ;;  %s1469_s8 = smov [#allocation5]  }
  0x12   : > { %s1886_s30 = scalar_select %p1566_p11, 1, 0 }
  0x13   : > { %s1887_s6 = scalar_select %p1570_p12, 1, 0 }
  0x14   : > { %s1888_s7 = scalar_select %p1574_p13, 1, 0 }
  0x15   : > { %p1230_p2 = pneg %p1574_p13  ;;  %s179_s9 = sshll.u32 %s1469_s8, 4  ;;  %s180_s9 = int_to_ptr.vmem [resolvable:$true] %s179_s9 }
  0x16   : > { %p1243_p4 = scmp.lt.s32.totalorder %s1467_s21, 2  ;;  %p1889_p0 = scmp.eq.s32.totalorder %s1535_s22, 0 }
  0x17   : > { %s196_s11 = sand.u32 1, %s1463_s20   ;;  %s1339_s16 = scalar_lea.hbm %s1875_s2, 64 }
  0x18   : > { %p1584_p7 = pnand %p1230_p2, %p1889_p0  ;;  %p1591_p3 = pnand %p1243_p4, %p1553_p5 }
  0x19   : > { %s1069_s13 = sshll.u32 %s196_s11, 5  ;;  %p1340_p8 = scmp.ne.s32.totalorder %s1875_s2, %s1339_s16 }
  0x1a   : > { %s1891_s12 = scalar_select %p1591_p3, 1, 0 }
  0x1b   : > { %p1341_p9 = pneg %p1584_p7  ;;  %p1346_p4 = scmp.lt.u32.totalorder %s1339_s16, %s1875_s2 }
  0x1d   : > { %p1342_p10 = pnand %p1341_p9, %p1340_p8 }
  0x1f   : > { %p1343_p2 = pneg %p1342_p10 }
  0x21   : > { %p1348_p5 = pnand %p1346_p4, %p1343_p2 }
  0x23   : > { %1351 = shalt.err (!%p1348_p5)
}
  0x24   : > { %s1352_s28 = scalar_lea.vmem %s180_s9, 64  ;;  %p1360_p11 = scmp.lt.s32.totalorder %s180_s9, %s180_s9 }
  0x25   : > { %p1353_p0 = scmp.ne.s32.totalorder %s180_s9, %s1352_s28  ;;  %p1361_p6 = scmp.lt.s32.totalorder %s1352_s28, %s1352_s28 }
  0x27   : > { %p1355_p1 = pnand %p1353_p0, %p1341_p9  ;;  %p1362_p13 = por %p1361_p6, %p1360_p11 }
  0x29   : > { %p1356_p12 = pneg %p1355_p1 }
  0x2b   : > { %p1363_p3 = pnand %p1362_p13, %p1356_p12 }
  0x2d   : > { %1366 = shalt.err (!%p1363_p3)
}
  0x2e   : > { %1233 = dma.hbm_to_vmem [thread:$0]  (!%p1584_p7), %s1875_s2, 64, %s180_s9, [#allocation6]  }
  0x2f   : > { %s1118_s15 = sshll.u32 %s1467_s21, 9  ;;  %s200_s16 = scalar_lea.vmem [#allocation2], %s1069_s13 }
  0x30   : > { %s207_s17 = sshll.u32 %s200_s16, 4  ;;  %s1615_s26 = scalar_lea.hbm %s1873_s0, %s1118_s15  ;;  %s1617_s17 = int_to_ptr.vmem [resolvable:$true] %s207_s17 }
  0x31   : > { %s1619_s10 = scalar_lea.sflag [#allocation3], %s196_s11  ;;  %s1367_s28 = scalar_lea.hbm %s1615_s26, 512 }
  0x32   : > { %p1368_p6 = scmp.ne.s32.totalorder %s1615_s26, %s1367_s28  ;;  %p1892_p11 = scmp.ne.s32.totalorder %s1891_s12, 0 }
  0x33   : > { %s1372_s8 = scalar_lea.hbm %s1873_s0, 1024  ;;  %p1373_p7 = scmp.lt.u32.totalorder %s1615_s26, %s1873_s0 }
  0x34   : > { %p1369_p12 = pneg %p1892_p11  ;;  %p1374_p3 = scmp.lt.u32.totalorder %s1372_s8, %s1367_s28 }
  0x35   : > { %p1376_p9 = scmp.lt.u32.totalorder %s1367_s28, %s1615_s26 }
  0x36   : > { %p1370_p13 = pnand %p1369_p12, %p1368_p6  ;;  %p1375_p8 = por %p1374_p3, %p1373_p7 }
  0x38   : > { %p1371_p1 = pneg %p1370_p13  ;;  %p1377_p10 = por %p1376_p9, %p1375_p8 }
  0x3a   : > { %p1378_p2 = pnand %p1377_p10, %p1371_p1 }
  0x3c   : > { %1381 = shalt.err (!%p1378_p2)
}
  0x3d   : > { %s1382_s11 = scalar_lea.vmem %s1617_s17, 512  ;;  %s1470_s16 = smov [#allocation2]  }
  0x3e   : > { %p1383_p4 = scmp.ne.s32.totalorder %s1617_s17, %s1382_s11  ;;  %s1387_s23 = sshll.u32 %s1470_s16, 4  ;;  %s1388_s23 = int_to_ptr.vmem [resolvable:$false] %s1387_s23 }
  0x3f   : > { %s1389_s25 = scalar_lea.vmem %s1388_s23, 1024  ;;  %p1390_p6 = scmp.lt.s32.totalorder %s1617_s17, %s1388_s23 }
  0x40   : > { %p1385_p5 = pnand %p1383_p4, %p1369_p12  ;;  %p1391_p13 = scmp.lt.s32.totalorder %s1389_s25, %s1382_s11 }
  0x42   : > { %p1386_p0 = pneg %p1385_p5  ;;  %p1392_p7 = por %p1391_p13, %p1390_p6 }
  0x44   : > { %p1393_p3 = pnand %p1392_p7, %p1386_p0 }
  0x46   : > { %1396 = shalt.err (!%p1393_p3)
}
  0x47   : > { %s1471_s28 = smov 128   ;;  %s1472_s9 = smov 8  }
  0x48   : > { %1237 = dma.hbm_to_vmem [thread:$0]  (!%p1892_p11), %s1615_s26, 512, %s1617_s17, %s1619_s10, %s1471_s28, %s1471_s28, %s1472_s9  }
  0x49   : > { %p1893_p12 = scmp.ne.s32.totalorder %s1888_s7, 0 }
  0x4a   : > { %s1650_s13 = sand.u32 (!%p1893_p12), 1, %s1459_s19   ;;  %p1894_p1 = scmp.ne.s32.totalorder (!%p1893_p12), %s1885_s29, 0 }
  0x4b   : > { %219 = sbr.rel (%p1893_p12) target bundleno = 1538 (0x602), region = 40  ;;  %s1073_s8 = sshll.u32 (!%p1893_p12), %s1650_s13, 5 }
  0x4c   : > { %s222_s14 = scalar_lea.sflag (!%p1893_p12), [#allocation3], %s1650_s13  ;;  %s225_s15 = scalar_lea.vmem (!%p1893_p12), [#allocation2], %s1073_s8 }
  0x52   : > { %1442 = dma.done.wait (%p1894_p1), %s222_s14, 512  }
  0x53   : > { %1444 = vsyncadd (%p1894_p1), %s222_s14, 4294966784  ;;  %p1895_p11 = scmp.eq.s32.totalorder %s1535_s22, 0 }
  0x55   : > { %1446 = dma.done.wait (%p1895_p11), [#allocation6], 64   ;;  %p1896_p8 = pmov %p1895_p11 }
  0x56   : > { %v1473_v0 = vmov 0.0   ;;  %v1666_v1 = vld [vmem:[%s225_s15] sm:$0xff]  ;;  %v1668_v2 = vld [vmem:[%s225_s15 + $0x8] sm:$0xff]  ;;  %v1670_v3 = vld [vmem:[%s225_s15 + $0x10] sm:$0xff]  ;;  %vm1474_vm0 = vmmov 0   ;;  %s1475_s29 = smov 1   ;;  %v267_v10 = vlaneseq }
  0x57   : > { %1448 = vsyncadd (%p1896_p8), [#allocation6], 4294967232  ;;  %1148 = vmatprep.subr.bf16.mxu0 %v1473_v0  ;;  %1156 = vmatprep.subr.bf16.mxu1 %v1473_v0  ;;  %v1291_v4 = vpack.i.bf16 %v1668_v2, %v1666_v1  ;;  %v1674_v5 = vld [vmem:[%s225_s15 + $0x18] sm:$0xff]  ;;  %s1476_s7 = smov 127   ;;  %v1689_v7 = vld [vmem:[%s1876_s3] sm:$0xff]  ;;  %v1477_v8 = vmov 0  }
  0x58   : > { %1152 = vmatprep.mubr.msk.bf16.mxu0 %vm1474_vm0, %v1473_v0  ;;  %1160 = vmatprep.mubr.msk.bf16.mxu1 %vm1474_vm0, %v1473_v0  ;;  %v1301_v6 = vpack.i.bf16 %v1674_v5, %v1670_v3  ;;  %v1478_v9 = vmov 1   ;;  %v1694_v11 = vand.u32 127, %v267_v10  ;;  %vm1479_vm2 = vmmov 1   ;;  %v265_v35 = vld [vmem:[%s1874_s1] sm:$0xf]  ;;  %s255_s23 = scalar_lea.vmem [#allocation7], %s1073_s8 }
  0x59   : > { %1292 = vrot.lane.b32.xlu0 %v1291_v4, %s1475_s29  ;;  %1312 = vset.pattern.permute.xlu1 %v1478_v9  ;;  %vm311_vm5 = vcmask 1043456   ;;  %vm307_vm6 = vcmask 195584   ;;  %vm759_vm7 = vcmask 64512   ;;  %vm845_vm8 = vcmask 1041408   ;;  %s982_s25 = sshll.u32 %s255_s23, 4  ;;  %s1119_s28 = sshll.u32 %s1535_s22, 9  ;;  %s1823_s25 = int_to_ptr.vmem [resolvable:$true] %s982_s25 }
  0x5a   : > { %1302 = vrot.lane.b32.xlu1 %v1301_v6, %s1475_s29  ;;  %1311 = vset.pattern.permute.xlu0 %v1477_v8  ;;  %vm269_vm1 = vcmp.ne.s32.totalorder %v1694_v11, 0  ;;  %vm270_vm4 = vcmp.ne.s32.totalorder %v1694_v11, 127  ;;  %vm753_vm9 = vcmask 1041409   ;;  %vm755_vm10 = vcmask 1042434   ;;  %s1829_s14 = scalar_lea.hbm %s1878_s5, %s1119_s28  ;;  %s969_s15 = scalar_lea.sflag [#allocation4], %s1650_s13 }
  0x5b   : > { %vm1697_vm3 = vmpackc.low %vm1479_vm2, %vm269_vm1  ;;  %vm757_vm11 = vcmask 1043459   ;;  %vm841_vm12 = vcmask 15360   ;;  %p1899_p10 = scmp.ne.s32.totalorder %s1886_s30, 0  ;;  %s1481_s22 = smov [#allocation7]  }
  0x5d   : > { %1297 = vrot.lane.b32.xlu0 %v1291_v4, %s1476_s7 }
  0x5e   : > { %1307 = vrot.lane.b32.xlu1 %v1301_v6, %s1476_s7 }
  0x61   : > { %490 = vperm.xlu0 %1311, %v1689_v7  }
  0x62   : > { %498 = vperm.xlu1 %1312, %v1689_v7  }
  0xcb   : > { %v1293_v12 = vpop.permute.xlu0 %1292 }
  0xcc   : > { %v1295_v13 = vunpack.i.h.bf16 %v1293_v12  ;;  %v1294_v14 = vunpack.i.l.bf16 %v1293_v12  ;;  %v1303_v15 = vpop.permute.xlu1 %1302 }
  0xcd   : > { %v1305_v29 = vunpack.i.h.bf16 %v1303_v15  ;;  %v1304_v30 = vunpack.i.l.bf16 %v1303_v15 }
  0xce   : > { %v1081_v17 = vpack.c.bf16 %v1668_v2, %v1295_v13  ;;  %v1077_v18 = vpack.c.bf16 %v1666_v1, %v1294_v14 }
  0xcf   : > { %v1298_v19 = vpop.permute.xlu0 %1297  ;;  %v1089_v38 = vpack.c.bf16 %v1674_v5, %v1305_v29  ;;  %v1085_v39 = vpack.c.bf16 %v1670_v3, %v1304_v30 }
  0xd0   : > { %v1300_v20 = vunpack.i.h.bf16 %v1298_v19  ;;  %v1299_v21 = vunpack.i.l.bf16 %v1298_v19  ;;  %1149 = vmatpush3.bf16.msk.msra.mxu0 %vm1697_vm3, %v1077_v18  ;;  %1157 = vmatpush3.bf16.msk.msra.mxu1 %vm1697_vm3, %v1081_v17  ;;  %v1308_v22 = vpop.permute.xlu1 %1307  ;;  %v1480_v19 = vmov 2  }
  0xd1   : > { %1150 = vmatprep.subr.bf16.mxu0 %v1473_v0  ;;  %1158 = vmatprep.subr.bf16.mxu1 %v1473_v0  ;;  %v1310_v23 = vunpack.i.h.bf16 %v1308_v22  ;;  %v1309_v24 = vunpack.i.l.bf16 %v1308_v22 }
  0xd2   : > { %v296_v25 = vsel %vm270_vm4, %v1300_v20, 0.0  ;;  %v295_v26 = vsel %vm270_vm4, %v1299_v21, 0.0  ;;  %1333 = vset.pattern.permute.xlu1 %v1480_v19  ;;  %1334 = vset.pattern.permute.xlu0 %v1480_v19 }
  0xd3   : > { %v300_v27 = vpack.c.bf16 %v295_v26, %v295_v26  ;;  %v302_v28 = vpack.c.bf16 %v296_v25, %v296_v25  ;;  %v298_v31 = vsel %vm270_vm4, %v1310_v23, 0.0  ;;  %v297_v32 = vsel %vm270_vm4, %v1309_v24, 0.0 }
  0xd4   : > { %v306_v36 = vpack.c.bf16 %v298_v31, %v298_v31  ;;  %v304_v37 = vpack.c.bf16 %v297_v32, %v297_v32 }
  0xd5   : > { %v313_v33 = vsel %vm311_vm5, %v300_v27, 0  ;;  %v356_v34 = vsel %vm311_vm5, %v302_v28, 0 }
  0xd6   : > { %1151 = vmatpush3.bf16.msra.mxu0 %v313_v33  ;;  %1159 = vmatpush3.bf16.msra.mxu1 %v356_v34  ;;  %v399_v40 = vsel %vm311_vm5, %v304_v37, 0  ;;  %v442_v41 = vsel %vm311_vm5, %v306_v36, 0 }
  0xd7   : > { %1164 = vmatprep.subr.bf16.mxu0 %v1473_v0  ;;  %1172 = vmatprep.subr.bf16.mxu1 %v1473_v0 }
  0xd9   : > { %1153 = vmatmul.mubr.msk.bf16.vlgmr.msra.gmra.mrb[0].mxu0 %vm307_vm6, %v265_v35  ;;  %1161 = vmatmul.mubr.msk.bf16.vlgmr.msra.gmra.mrb[0].mxu1 %vm307_vm6, %v265_v35 }
  0xda   : > { %1165 = vmatpush3.bf16.msk.msra.mxu0 %vm1697_vm3, %v1085_v39  ;;  %1173 = vmatpush3.bf16.msk.msra.mxu1 %vm1697_vm3, %v1089_v38  ;;  %v266_v39 = vld [vmem:[#allocation5] sm:$0xf] }
  0xdb   : > { %1166 = vmatprep.subr.bf16.mxu0 %v1473_v0  ;;  %1174 = vmatprep.subr.bf16.mxu1 %v1473_v0 }
  0xdc   : > { %1168 = vmatprep.mubr.msk.bf16.mxu0 %vm1474_vm0, %v1473_v0  ;;  %1176 = vmatprep.mubr.msk.bf16.mxu1 %vm1474_vm0, %v1473_v0 }
  0xde   : > { %1167 = vmatpush3.bf16.msra.mxu0 %v399_v40  ;;  %1175 = vmatpush3.bf16.msra.mxu1 %v442_v41 }
  0xdf   : > { %1180 = vmatprep.subr.bf16.mxu0 %v1473_v0  ;;  %1188 = vmatprep.subr.bf16.mxu1 %v1473_v0 }
  0xe0   : > { %v491_v42 = vpop.permute.xlu0 %490 }
  0xe1   : > { %1169 = vmatmul.mubr.msk.bf16.vlgmr.msra.gmra.mrb[4].mxu0 %vm307_vm6, %v265_v35  ;;  %1177 = vmatmul.mubr.msk.bf16.vlgmr.msra.gmra.mrb[4].mxu1 %vm307_vm6, %v265_v35  ;;  %v499_v43 = vpop.permute.xlu1 %498 }
  0xe2   : > { %1184 = vmatprep.mubr.msk.bf16.mxu0 %vm1474_vm0, %v1473_v0  ;;  %1192 = vmatprep.mubr.msk.bf16.mxu1 %vm1474_vm0, %v1473_v0 }
 0x1ac   : > { %v349_v44 = vpop.f32.mrb[0].mxu0  ;;  %v392_v45 = vpop.f32.mrb[0].mxu1 }
 0x1ad   : > { %v484_v46 = vmax.f32 %v349_v44, 0.0  ;;  %v485_v47 = vmax.f32 %v392_v45, 0.0  ;;  %v1154_v48 = vpop.f32.mrb[1].mxu0  ;;  %v1162_v49 = vpop.f32.mrb[1].mxu1 }
 0x1ae   : > { %v352_v50 = vpop.f32.mrb[2].mxu0  ;;  %v395_v51 = vpop.f32.mrb[2].mxu1 }
 0x1af   : > { %v493_v52 = vmul.f32 %v491_v42, %v484_v46  ;;  %v494_v53 = vmul.f32 %v491_v42, %v485_v47  ;;  %v1155_v54 = vpop.f32.mrb[3].mxu0  ;;  %v1163_v55 = vpop.f32.mrb[3].mxu1 }
 0x1b1   : > { %v501_v56 = vadd.f32 %v499_v43, %v493_v52  ;;  %v502_v57 = vadd.f32 %v499_v43, %v494_v53 }
 0x1b3   : > { %v1318_v58 = vpack.i.bf16 %v502_v57, %v501_v56 }
 0x1b4   : > { %v435_v59 = vpop.f32.mrb[4].mxu0  ;;  %v478_v60 = vpop.f32.mrb[4].mxu1 }
 0x1b5   : > { %v486_v61 = vmax.f32 %v435_v59, 0.0  ;;  %v487_v62 = vmax.f32 %v478_v60, 0.0  ;;  %v1178_v63 = vpop.f32.mrb[5].mxu1  ;;  %1319 = vrot.lane.b32.xlu0 %v1318_v58, %s1476_s7  ;;  %1314 = vrot.lane.b32.xlu1 %v1318_v58, %s1475_s29  ;;  %v1170_v4 = vpop.f32.mrb[5].mxu0 }
 0x1b6   : > { %v438_v6 = vpop.f32.mrb[6].mxu0  ;;  %v481_v8 = vpop.f32.mrb[6].mxu1 }
 0x1b7   : > { %v495_v9 = vmul.f32 %v491_v42, %v486_v61  ;;  %v496_v12 = vmul.f32 %v491_v42, %v487_v62  ;;  %v1171_v13 = vpop.f32.mrb[7].mxu0  ;;  %v1179_v14 = vpop.f32.mrb[7].mxu1 }
 0x1b8   : > { %v730_v13 = vshrl.u32 %v267_v10, 7 }
 0x1b9   : > { %v503_v15 = vadd.f32 %v499_v43, %v495_v9  ;;  %v504_v17 = vadd.f32 %v499_v43, %v496_v12  ;;  %v264_v9 = vld [vmem:[%s1877_s4] sm:$0x3f] }
 0x1ba   : > { %v840_v12 = vrot.slane %v264_v9, 2 }
 0x1bb   : > { %v1328_v18 = vpack.i.bf16 %v504_v17, %v503_v15 }
 0x1bd   : > { %1329 = vrot.lane.b32.xlu0 %v1328_v18, %s1476_s7  ;;  %1324 = vrot.lane.b32.xlu1 %v1328_v18, %s1475_s29  ;;  %s1397_s29 = scalar_lea.vmem %s1823_s25, 512  ;;  %s1401_s7 = sshll.u32 %s1481_s22, 4  ;;  %s1402_s7 = int_to_ptr.vmem [resolvable:$false] %s1401_s7 }
 0x1be   : > { %p1398_p9 = scmp.ne.s32.totalorder %s1823_s25, %s1397_s29  ;;  %s1403_s12 = scalar_lea.vmem %s1402_s7, 1024 }
 0x1bf   : > { %p1404_p5 = scmp.lt.s32.totalorder %s1823_s25, %s1402_s7  ;;  %p1405_p0 = scmp.lt.s32.totalorder %s1403_s12, %s1397_s29 }
 0x1c0   : > { %p1399_p2 = pnand %p1398_p9, %p1899_p10 }
 0x1c1   : > { %538 = vperm.xlu1 %1333, %v1689_v7   ;;  %p1406_p6 = por %p1405_p0, %p1404_p5 }
 0x1c2   : > { %p1400_p4 = pneg %p1399_p2 }
 0x1c4   : > { %p1407_p13 = pnand %p1406_p6, %p1400_p4 }
 0x227   : > { %v1320_v20 = vpop.permute.xlu0 %1319  ;;  %v1315_v21 = vpop.permute.xlu1 %1314 }
 0x228   : > { %v1322_v22 = vunpack.i.h.bf16 %v1320_v20  ;;  %v1321_v23 = vunpack.i.l.bf16 %v1320_v20  ;;  %v1317_v24 = vunpack.i.h.bf16 %v1315_v21  ;;  %v1316_v25 = vunpack.i.l.bf16 %v1315_v21 }
 0x22a   : > { %v526_v26 = vsel %vm270_vm4, %v1322_v22, 0.0  ;;  %v525_v27 = vsel %vm270_vm4, %v1321_v23, 0.0  ;;  %v1097_v28 = vpack.c.bf16 %v502_v57, %v1317_v24  ;;  %v1093_v29 = vpack.c.bf16 %v501_v56, %v1316_v25 }
 0x22b   : > { %v532_v30 = vpack.c.bf16 %v526_v26, %v526_v26  ;;  %v530_v31 = vpack.c.bf16 %v525_v27, %v525_v27 }
 0x22c   : > { %1181 = vmatpush3.bf16.msk.msra.mxu0 %vm1697_vm3, %v1093_v29  ;;  %1189 = vmatpush3.bf16.msk.msra.mxu1 %vm1697_vm3, %v1097_v28 }
 0x22d   : > { %1182 = vmatprep.subr.bf16.mxu0 %v1473_v0  ;;  %1190 = vmatprep.subr.bf16.mxu1 %v1473_v0  ;;  %v545_v33 = vsel %vm311_vm5, %v530_v31, 0  ;;  %v588_v34 = vsel %vm311_vm5, %v532_v30, 0  ;;  %v731_v30 = vsub.s32 4, %v730_v13 }
 0x22f   : > { %v1330_v7 = vpop.permute.xlu0 %1329  ;;  %v1325_v32 = vpop.permute.xlu1 %1324 }
 0x230   : > { %v1332_v35 = vunpack.i.h.bf16 %v1330_v7  ;;  %v1331_v36 = vunpack.i.l.bf16 %v1330_v7  ;;  %v1327_v37 = vunpack.i.h.bf16 %v1325_v32  ;;  %v1326_v38 = vunpack.i.l.bf16 %v1325_v32  ;;  %1183 = vmatpush3.bf16.msra.mxu0 %v545_v33  ;;  %1191 = vmatpush3.bf16.msra.mxu1 %v588_v34 }
 0x231   : > { %1196 = vmatprep.subr.bf16.mxu0 %v1473_v0  ;;  %1204 = vmatprep.subr.bf16.mxu1 %v1473_v0  ;;  %v838_v34 = vsub.s32 5, %v730_v13 }
 0x232   : > { %v528_v40 = vsel %vm270_vm4, %v1332_v35, 0.0  ;;  %v527_v41 = vsel %vm270_vm4, %v1331_v36, 0.0  ;;  %v1105_v42 = vpack.c.bf16 %v504_v17, %v1327_v37  ;;  %v1101_v43 = vpack.c.bf16 %v503_v15, %v1326_v38 }
 0x233   : > { %v536_v44 = vpack.c.bf16 %v528_v40, %v528_v40  ;;  %v534_v45 = vpack.c.bf16 %v527_v41, %v527_v41  ;;  %1185 = vmatmul.mubr.msk.bf16.vlgmr.msra.gmra.mrb[8].mxu0 %vm307_vm6, %v266_v39  ;;  %1193 = vmatmul.mubr.msk.bf16.vlgmr.msra.gmra.mrb[8].mxu1 %vm307_vm6, %v266_v39  ;;  %v739_v17 = vsub.s32 %v1694_v11, %v730_v13 }
 0x234   : > { %1197 = vmatpush3.bf16.msk.msra.mxu0 %vm1697_vm3, %v1101_v43  ;;  %1205 = vmatpush3.bf16.msk.msra.mxu1 %vm1697_vm3, %v1105_v42  ;;  %v732_v11 = vrot.slane %v264_v9, %v731_v30  ;;  %v839_v35 = vrot.slane %v264_v9, %v838_v34  ;;  %v933_v42 = vsub.s32 1, %v730_v13  ;;  %v926_v43 = vsub.s32 0, %v730_v13 }
 0x235   : > { %1198 = vmatprep.subr.bf16.mxu0 %v1473_v0  ;;  %1206 = vmatprep.subr.bf16.mxu1 %v1473_v0  ;;  %v631_v46 = vsel %vm311_vm5, %v534_v45, 0  ;;  %v674_v47 = vsel %vm311_vm5, %v536_v44, 0 }
 0x236   : > { %1200 = vmatprep.mubr.msk.bf16.mxu0 %vm1474_vm0, %v1473_v0  ;;  %1208 = vmatprep.mubr.msk.bf16.mxu1 %vm1474_vm0, %v1473_v0 }
 0x238   : > { %1199 = vmatpush3.bf16.msra.mxu0 %v631_v46  ;;  %1207 = vmatpush3.bf16.msra.mxu1 %v674_v47  ;;  %v940_v47 = vsub.s32 2, %v730_v13 }
 0x239   : > { %1212 = vmatprep.subr.mxu0 %v1473_v0  ;;  %1217 = vmatprep.subr.mxu1 %v1473_v0 }
 0x23b   : > { %1201 = vmatmul.mubr.msk.bf16.vlgmr.msra.gmra.mrb[12].mxu0 %vm307_vm6, %v266_v39  ;;  %1209 = vmatmul.mubr.msk.bf16.vlgmr.msra.gmra.mrb[12].mxu1 %vm307_vm6, %v266_v39 }
 0x23c   : > { %1214 = vmatprep.mubr.msk.f32.mxu0 %vm1474_vm0, %v1473_v0  ;;  %1219 = vmatprep.mubr.msk.f32.mxu1 %vm1474_vm0, %v1473_v0 }
 0x23d   : > { %1218 = vmatpush3.msk.msra.mxu1 %vm845_vm8, %v840_v12 }
 0x240   : > { %v539_v16 = vpop.permute.xlu1 %538 }
 0x241   : > { %1213 = vmatpush3.xpose.msk.msra.mxu0 %vm759_vm7, %v264_v9 }
 0x306   : > { %v581_v48 = vpop.f32.mrb[8].mxu0  ;;  %v624_v49 = vpop.f32.mrb[8].mxu1 }
 0x307   : > { %v1186_v50 = vpop.f32.mrb[9].mxu0  ;;  %v1194_v51 = vpop.f32.mrb[9].mxu1  ;;  %v1794_v52 = vadd.f32 %v624_v49, %v539_v16  ;;  %v1796_v53 = vadd.f32 %v581_v48, %v539_v16  ;;  %v947_v48 = vsub.s32 3, %v730_v13 }
 0x308   : > { %v584_v54 = vpop.f32.mrb[10].mxu0  ;;  %v627_v55 = vpop.f32.mrb[10].mxu1 }
 0x309   : > { %v1187_v56 = vpop.f32.mrb[11].mxu0  ;;  %718 = vadd.xlane.f32.xlu1 %v1794_v52  ;;  %716 = vadd.xlane.f32.xlu0 %v1796_v53  ;;  %v1195_v57 = vpop.f32.mrb[11].mxu1 }
 0x30e   : > { %v667_v58 = vpop.f32.mrb[12].mxu0  ;;  %v710_v59 = vpop.f32.mrb[12].mxu1 }
 0x30f   : > { %v1800_v0 = vadd.f32 %v667_v58, %v539_v16  ;;  %v1202_v60 = vpop.f32.mrb[13].mxu0  ;;  %v1210_v61 = vpop.f32.mrb[13].mxu1  ;;  %v1803_v8 = vadd.f32 %v710_v59, %v539_v16 }
 0x310   : > { %v670_v62 = vpop.f32.mrb[14].mxu0  ;;  %v713_v63 = vpop.f32.mrb[14].mxu1 }
 0x311   : > { %720 = vadd.xlane.f32.xlu0 %v1800_v0  ;;  %v1203_v4 = vpop.f32.mrb[15].mxu0  ;;  %v1211_v6 = vpop.f32.mrb[15].mxu1 }
 0x315   : > { %722 = vadd.xlane.f32.xlu0 %v1803_v8 }
 0x396   : > { %v719_v14 = vpop.xlane.xlu1 %718  ;;  %v717_v15 = vpop.xlane.xlu0 %716 }
 0x397   : > { %v726_v18 = vmul.f32 0.0078125, %v719_v14  ;;  %v725_v19 = vmul.f32 0.0078125, %v717_v15 }
 0x399   : > { %v744_v22 = vrot.slane %v726_v18, %v739_v17  ;;  %v740_v23 = vrot.slane %v725_v19, %v739_v17 }
 0x39b   : > { %v754_v27 = vsel %vm753_vm9, %v744_v22, %v740_v23 }
 0x39e   : > { %v721_v20 = vpop.xlane.xlu0 %720 }
 0x39f   : > { %v727_v21 = vmul.f32 0.0078125, %v721_v20 }
 0x3a1   : > { %v748_v24 = vrot.slane %v727_v21, %v739_v17 }
 0x3a2   : > { %v723_v25 = vpop.xlane.xlu0 %722 }
 0x3a3   : > { %v728_v26 = vmul.f32 0.0078125, %v723_v25  ;;  %v756_v29 = vsel %vm755_vm10, %v748_v24, %v754_v27 }
 0x3a5   : > { %v752_v28 = vrot.slane %v728_v26, %v739_v17 }
 0x3a7   : > { %v758_v10 = vsel %vm757_vm11, %v752_v28, %v756_v29 }
 0x3a8   : > { %1215 = vmatmul.mubr.msk.f32.vlgmr.msra.gmra.mrb[16].mxu0 %vm759_vm7, %v758_v10 }
 0x47b   : > { %v831_v31 = vpop.f32.mrb[16].mxu0 }
 0x47c   : > { %v832_v7 = vadd.f32 %v831_v31, %v732_v11  ;;  %v1216_v32 = vpop.f32.mrb[17].mxu0 }
 0x47e   : > { %v835_v33 = vmax.f32 %v832_v7, 0.0 }
 0x480   : > { %1220 = vmatmul.mubr.msk.f32.vlgmr.msra.gmra.mrb[16].mxu1 %vm841_vm12, %v835_v33 }
 0x553   : > { %v914_v36 = vpop.f32.mrb[16].mxu1 }
 0x554   : > { %v915_v37 = vadd.f32 %v914_v36, %v839_v35  ;;  %v1221_v38 = vpop.f32.mrb[17].mxu1 }
 0x556   : > { %v1112_v39 = vmul.f32 -1.442695, %v915_v37 }
 0x558   : > { %1335 = vpow2.f32 %v1112_v39 }
 0x562   : > { %v1336_v40 = vpop.eup %1335 }
 0x563   : > { %v921_v41 = vadd.f32 1.0, %v1336_v40 }
 0x565   : > { %1337 = vrcp.f32 %v921_v41 }
 0x56f   : > { %v1338_v44 = vpop.eup %1337 }
 0x570   : > { %v934_v45 = vrot.slane %v1338_v44, %v933_v42  ;;  %v927_v46 = vrot.slane %v1338_v44, %v926_v43  ;;  %v941_v16 = vrot.slane %v1338_v44, %v940_v47  ;;  %v948_v49 = vrot.slane %v1338_v44, %v947_v48 }
 0x572   : > { %936 = vbcast.lane.b32.xlu0 %v934_v45, 256  ;;  %929 = vbcast.lane.b32.xlu1 %v927_v46, 256 }
 0x576   : > { %943 = vbcast.lane.b32.xlu1 %v941_v16, 256 }
 0x57a   : > { %950 = vbcast.lane.b32.xlu1 %v948_v49, 256 }
 0x5e4   : > { %v937_v50 = vpop.permute.xlu0 %936  ;;  %v930_v51 = vpop.permute.xlu1 %929 }
 0x5e5   : > { %v953_v54 = vmul.f32 %v937_v50, %v1794_v52  ;;  %v952_v55 = vmul.f32 %v930_v51, %v1796_v53 }
 0x5e7   : > { %v957_v56 = vadd.f32 %v953_v54, %v1668_v2  ;;  %v956_v57 = vadd.f32 %v952_v55, %v1666_v1 }
 0x5e8   : > { %v944_v58 = vpop.permute.xlu1 %943 }
 0x5e9   : > { %v961_v59 = vmax.f32 %v957_v56, 0.0  ;;  %v960_v60 = vmax.f32 %v956_v57, 0.0  ;;  %v954_v61 = vmul.f32 %v944_v58, %v1800_v0 }
 0x5eb   : > { %965 = vst [vmem:[%s255_s23 + $0x8] sm:$0xff] %v961_v59  ;;  %964 = vst [vmem:[%s255_s23] sm:$0xff] %v960_v60  ;;  %v958_v52 = vadd.f32 %v954_v61, %v1670_v3 }
 0x5ec   : > { %v951_v62 = vpop.permute.xlu1 %950 }
 0x5ed   : > { %v962_v53 = vmax.f32 %v958_v52, 0.0  ;;  %v955_v2 = vmul.f32 %v951_v62, %v1803_v8 }
 0x5ef   : > { %966 = vst [vmem:[%s255_s23 + $0x10] sm:$0xff] %v962_v53  ;;  %v959_v1 = vadd.f32 %v955_v2, %v1674_v5 }
 0x5f1   : > { %v963_v3 = vmax.f32 %v959_v1, 0.0 }
 0x5f3   : > { %967 = vst [vmem:[%s255_s23 + $0x18] sm:$0xff] %v963_v3 }
 0x5f4   : > { %1410 = shalt.err (!%p1407_p13)
}
 0x5f5   : > { %s1411_s17 = scalar_lea.hbm %s1829_s14, 512  ;;  %s1415_s11 = scalar_lea.hbm %s1878_s5, 1024 }
 0x5f6   : > { %p1412_p7 = scmp.ne.s32.totalorder %s1829_s14, %s1411_s17  ;;  %p1416_p1 = scmp.lt.u32.totalorder %s1829_s14, %s1878_s5 }
 0x5f7   : > { %p1417_p11 = scmp.lt.u32.totalorder %s1415_s11, %s1411_s17  ;;  %p1419_p9 = scmp.lt.u32.totalorder %s1411_s17, %s1829_s14 }
 0x5f8   : > { %p1413_p3 = pnand %p1412_p7, %p1899_p10 }
 0x5f9   : > { %p1418_p8 = por %p1417_p11, %p1416_p1 }
 0x5fa   : > { %p1414_p12 = pneg %p1413_p3 }
 0x5fb   : > { %p1420_p2 = por %p1419_p9, %p1418_p8 }
 0x5fd   : > { %p1421_p4 = pnand %p1420_p2, %p1414_p12 }
 0x5ff   : > { %1424 = shalt.err (!%p1421_p4)
}
 0x600   : > { %s1482_s28 = smov 128   ;;  %s1483_s9 = smov 8  }
 0x601   : > { %1228 = dma.vmem_to_hbm [thread:$0]  (%p1899_p10), %s1823_s25, 512, %s1829_s14, %s969_s15, %s1482_s28, %s1482_s28, %s1483_s9  }
 0x602 PF: > { %s997_s8 = sand.u32 1, %s1455_s18   ;;  %p1900_p5 = scmp.ne.s32.totalorder %s1887_s6, 0 }
 0x603   : > { %p1901_p0 = scmp.ge.s32.totalorder %s1467_s21, 2  ;;  %s998_s29 = scalar_lea.sflag [#allocation4], %s997_s8 }
 0x605   : > { %p1239_p6 = pnand %p1901_p0, %p1900_p5 }
 0x607   : > { %1450 = dma.done.wait (!%p1239_p6), %s998_s29, 512  }
 0x608   : > { %1452 = vsyncadd (!%p1239_p6), %s998_s29, 4294966784  ;;  %p19_p13 = scmp.ge.s32.totalorder %s1539_s24, 4   ;;  %s1902_s18 = smov %s1459_s19 }
 0x609   : > { %s1903_s19 = smov %s1463_s20  ;;  %s1904_s20 = smov %s1551_s27 }
 0x60a   : > { %s1905_s21 = smov %s1539_s24  ;;  %21 = sbr.rel (!%p19_p13) target bundleno = 6 (0x6), region = 89 }
 0x611   :  { %1003 = vsyncpa [#allocation3], 1 }
 0x612   :  { %1005 = vsyncpa [#allocation3 + $0x1], 1 }
 0x613   :  { %1006 = vsyncpa [#allocation6], 1 }
 0x614   :  { %1007 = vsyncpa [#allocation4], 1 }
 0x615   :  { %1009 = vsyncpa [#allocation4 + $0x1], 1 }

</bundles_post_ra>
